<compile_context>
chip_gen: v6e
topology: v6e:2x2x1
jax: 0.10.0
libtpu: 0.0.40
codegen_flags: <defaults>
</compile_context>

<pallas_src>
import functools

import jax
import jax.numpy as jnp
from jax import lax
from jax.experimental import pallas as pl
from jax.experimental.pallas import tpu as pltpu


def _dsconv_kernel(x_ref, halo_ref, dw_ref, pw_ref, b_ref, o_ref, xpad_ref, *,
                   k, off, mxu_bf16):
    # x_ref   : (Cin, Lt)       one batch element's L-tile, NCL layout
    # halo_ref: (Cin, 2*pad)    [left halo | right halo] from neighbouring tiles
    # dw_ref  : (Cin, k)        depthwise weights
    # pw_ref  : (Cout, Cin)     pointwise weights
    # b_ref   : (Cout, 1)       pointwise bias
    # o_ref   : (Cout, Lt)      output block
    # xpad_ref: (Cin, off+Lt+pad) VMEM scratch holding the halo-padded line
    Cin, Lt = x_ref.shape
    pad = k // 2

    # Hoisted casts (once, not per tap).
    x32 = x_ref[...].astype(jnp.float32)
    dw32 = dw_ref[...].astype(jnp.float32)

    # Centre tap initialises the accumulator: no shift, no halo needed.
    acc = x32 * dw32[:, pad:pad + 1]

    if pad > 0:
        # Build the neighbour/zero-padded line once in VMEM scratch; each tap below
        # is then a static lane-offset slice (XLU, otherwise idle) * weight + add
        # (2 VPU ops per tap vs 4 for the roll+iota+cmp+select scheme).
        halo32 = halo_ref[...].astype(jnp.float32)
        xpad_ref[:, off - pad:off] = halo32[:, :pad]          # left halo (tiny, masked)
        xpad_ref[:, off:off + Lt] = x32                       # lane-aligned bulk store
        xpad_ref[:, off + Lt:off + Lt + pad] = halo32[:, pad:]  # right halo (tiny)
        for t in range(k):
            if t == pad:
                continue
            s = off - pad + t
            acc = acc + xpad_ref[:, s:s + Lt] * dw32[:, t:t + 1]

    # Pointwise 1x1 conv on the MXU: (Cout, Cin) @ (Cin, Lt), then bias + ReLU.
    if mxu_bf16:
        y = jnp.dot(pw_ref[...].astype(jnp.bfloat16), acc.astype(jnp.bfloat16),
                    preferred_element_type=jnp.float32)
    else:
        y = jnp.dot(pw_ref[...].astype(jnp.float32), acc,
                    preferred_element_type=jnp.float32,
                    precision=lax.Precision.HIGHEST)
    y = y + b_ref[...].astype(jnp.float32)
    o_ref[...] = jnp.maximum(y, 0.0).astype(o_ref.dtype)


def _pick_l_tile(L, pad):
    # Prefer 512-lane tiles (~85% HBM roofline measured; multiple of 256 for the
    # v6e/v7x MXU N dim).  The tile must divide L (no remainder handling) and must
    # be larger than the halo.
    for t in (512, 1024, 256, 128):
        if L % t == 0 and t > pad:
            return t
    return L  # single tile (small / awkward L)


def _build_halos(x, pad, Lt, T):
    """(N, T, Cin, 2*pad): per-tile [left | right] halo columns, zeros at the ends."""
    N, Cin, _ = x.shape
    if pad == 0:
        # k == 1: dummy, never read by the kernel.
        return jnp.zeros((N, T, Cin, 1), dtype=x.dtype)
    zeros = jnp.zeros((N, Cin, pad), dtype=x.dtype)
    per_tile = []
    for j in range(T):  # T is small (L/Lt); only 2*pad*T columns of extra HBM traffic
        left = zeros if j == 0 else x[:, :, j * Lt - pad:j * Lt]
        right = zeros if j == T - 1 else x[:, :, (j + 1) * Lt:(j + 1) * Lt + pad]
        per_tile.append(jnp.concatenate([left, right], axis=-1))
    return jnp.stack(per_tile, axis=1)


def depthwise_separable_conv(x, dw_weight, pw_weight, pw_bias, k, *, mxu_bf16=None):
    """x: (N, Cin, L) NCL (PyTorch convention).
    dw_weight: (Cin, 1, k)   (nn.Conv1d groups=Cin weight)
    pw_weight: (Cout, Cin, 1)
    pw_bias:   (Cout,)
    returns (N, Cout, L)"""
    N, Cin, L = x.shape
    Cout = pw_weight.shape[0]

    # TODO(synk): even k with padding=k//2 yields L+1 outputs in PyTorch; only odd k supported.
    assert k % 2 == 1, "only odd kernel sizes keep the PyTorch output length L"
    pad = k // 2

    if mxu_bf16 is None:
        mxu_bf16 = (x.dtype == jnp.bfloat16)

    Lt = _pick_l_tile(L, pad)
    T = L // Lt

    halos = _build_halos(x, pad, Lt, T)
    halo_w = halos.shape[-1]

    # Weight reshapes only (tiny arrays); activations are passed through untouched.
    dw2 = dw_weight[:, 0, :]              # (Cin, k)
    pw2 = pw_weight[:, :, 0]              # (Cout, Cin)
    b2 = pw_bias.reshape(Cout, 1)         # (Cout, 1)

    # Offset of x inside the padded scratch line, rounded up to a lane tile so the
    # bulk store is aligned/unmasked.
    off = 0 if pad == 0 else ((pad + 127) // 128) * 128
    scratch_w = (off + Lt + pad) if pad > 0 else Lt

    kernel = functools.partial(_dsconv_kernel, k=k, off=off, mxu_bf16=mxu_bf16)

    return pl.pallas_call(
        kernel,
        out_shape=jax.ShapeDtypeStruct((N, Cout, L), x.dtype),
        grid_spec=pltpu.PrefetchScalarGridSpec(
            num_scalar_prefetch=0,
            grid=(N, T),
            in_specs=[
                pl.BlockSpec((pl.Squeezed(), Cin, Lt), lambda n, j: (n, 0, j)),
                pl.BlockSpec((pl.Squeezed(), pl.Squeezed(), Cin, halo_w),
                             lambda n, j: (n, j, 0, 0)),
                pl.BlockSpec((Cin, k), lambda n, j: (0, 0)),
                pl.BlockSpec((Cout, Cin), lambda n, j: (0, 0)),
                pl.BlockSpec((Cout, 1), lambda n, j: (0, 0)),
            ],
            out_specs=pl.BlockSpec((pl.Squeezed(), Cout, Lt), lambda n, j: (n, 0, j)),
            scratch_shapes=[pltpu.VMEM((Cin, scratch_w), jnp.float32)],
        ),
        compiler_params=pltpu.CompilerParams(
            dimension_semantics=("parallel", "parallel"),
        ),
    )(x, halos, dw2, pw2, b2)


def _reference(x, dw_weight, pw_weight, pw_bias, k):
    # Pure-JAX reference matching F.relu(pointwise(depthwise(x))).
    N, Cin, L = x.shape
    pad = k // 2
    xp = jnp.pad(x, ((0, 0), (0, 0), (pad, pad)))
    y = jnp.zeros((N, Cin, L), dtype=jnp.float32)
    for t in range(k):
        y = y + xp[:, :, t:t + L] * dw_weight[:, 0, t][None, :, None]
    out = jnp.einsum('ncl,oc->nol', y, pw_weight[:, :, 0],
                     precision=lax.Precision.HIGHEST) + pw_bias[None, :, None]
    return jnp.maximum(out, 0.0)


if __name__ == "__main__":
    key = jax.random.PRNGKey(0)

    def run_case(N, Cin, Cout, L, K, case_key):
        k_x, k_dw, k_pw, k_b = jax.random.split(case_key, 4)
        x = jax.random.normal(k_x, (N, Cin, L), dtype=jnp.float32)
        # Deterministic parameter init (synthetic; shapes match nn.Conv1d weights).
        dw_weight = jax.random.normal(k_dw, (Cin, 1, K), dtype=jnp.float32) * 0.1
        pw_weight = jax.random.normal(k_pw, (Cout, Cin, 1), dtype=jnp.float32) * 0.1
        pw_bias = jax.random.normal(k_b, (Cout,), dtype=jnp.float32) * 0.1

        out = depthwise_separable_conv(x, dw_weight, pw_weight, pw_bias, K)
        out = jax.block_until_ready(out)

        ref = _reference(x, dw_weight, pw_weight, pw_bias, K)
        assert out.shape == (N, Cout, L), out.shape
        assert jnp.allclose(out, ref, atol=1e-5, rtol=1e-5), \
            f"max err = {jnp.max(jnp.abs(out - ref))}"

    k1, k2 = jax.random.split(key)
    # Small, module-consistent shapes: (batch, in_ch, seq_len) — single L tile.
    run_case(N=2, Cin=32, Cout=64, L=16, K=5, case_key=k1)
    # Multi-tile path: Lt=128, 3 L-tiles, exercises the cross-tile halo handling.
    run_case(N=2, Cin=16, Cout=32, L=384, K=7, case_key=k2)

    print("KERNEL_OK")
</pallas_src>

<mosaic_0001>
module attributes {stable_mosaic.version = 11 : i64} {
  func.func @_dsconv_kernel(%arg0: i32, %arg1: i32, %arg2: memref<1x32x16xf32, #tpu.memory_space<vmem>>, %arg3: memref<1x1x32x4xf32, #tpu.memory_space<vmem>>, %arg4: memref<32x5xf32, #tpu.memory_space<vmem>>, %arg5: memref<64x32xf32, #tpu.memory_space<vmem>>, %arg6: memref<64x1xf32, #tpu.memory_space<vmem>>, %arg7: memref<1x64x16xf32, #tpu.memory_space<vmem>>, %arg8: memref<32x146xf32, #tpu.memory_space<vmem>>) attributes {dimension_semantics = [#tpu.dimension_semantics<parallel>, #tpu.dimension_semantics<parallel>], iteration_bounds = array<i64: 2, 1>, scalar_prefetch = 0 : i64, scratch_operands = 1 : i64, tpu.core_type = #tpu.core_type<tc>, window_params = [{transform_indices = @transform_0, window_bounds = array<i64: 1, 32, 16>}, {transform_indices = @transform_1, window_bounds = array<i64: 1, 1, 32, 4>}, {pipeline_mode = #tpu.pipeline_mode<synchronous>, transform_indices = @transform_2, window_bounds = array<i64: 32, 5>}, {pipeline_mode = #tpu.pipeline_mode<synchronous>, transform_indices = @transform_3, window_bounds = array<i64: 64, 32>}, {pipeline_mode = #tpu.pipeline_mode<synchronous>, transform_indices = @transform_4, window_bounds = array<i64: 64, 1>}, {transform_indices = @transform_5, window_bounds = array<i64: 1, 64, 16>}]} {
    %c0 = arith.constant 0 : index
    %c0_0 = arith.constant 0 : index
    %c0_1 = arith.constant 0 : index
    %0 = vector.load %arg2[%c0, %c0_0, %c0_1] : memref<1x32x16xf32, #tpu.memory_space<vmem>>, vector<1x32x16xf32>
    %1 = vector.shape_cast %0 : vector<1x32x16xf32> to vector<32x16xf32>
    %c0_2 = arith.constant 0 : index
    %c0_3 = arith.constant 0 : index
    %2 = vector.load %arg4[%c0_2, %c0_3] : memref<32x5xf32, #tpu.memory_space<vmem>>, vector<32x5xf32>
    %3 = vector.extract_strided_slice %2 {offsets = [0, 2], sizes = [32, 1], strides = [1, 1]} : vector<32x5xf32> to vector<32x1xf32>
    %4 = vector.broadcast %3 : vector<32x1xf32> to vector<32x16xf32>
    %5 = arith.mulf %1, %4 : vector<32x16xf32>
    %c0_4 = arith.constant 0 : index
    %c0_5 = arith.constant 0 : index
    %c0_6 = arith.constant 0 : index
    %c0_7 = arith.constant 0 : index
    %6 = vector.load %arg3[%c0_4, %c0_5, %c0_6, %c0_7] : memref<1x1x32x4xf32, #tpu.memory_space<vmem>>, vector<1x1x32x4xf32>
    %7 = vector.shape_cast %6 : vector<1x1x32x4xf32> to vector<32x4xf32>
    %8 = vector.extract_strided_slice %7 {offsets = [0, 0], sizes = [32, 2], strides = [1, 1]} : vector<32x4xf32> to vector<32x2xf32>
    %c0_8 = arith.constant 0 : index
    %c126 = arith.constant 126 : index
    %9 = vector.load %arg8[%c0_8, %c126] : memref<32x146xf32, #tpu.memory_space<vmem>>, vector<32x2xf32>
    tpu.vector_store %arg8[%c0_8, %c126], %8 {strides = array<i32>} : memref<32x146xf32, #tpu.memory_space<vmem>>, vector<32x2xf32>,
    %c0_9 = arith.constant 0 : index
    %c128 = arith.constant 128 : index
    %10 = vector.load %arg8[%c0_9, %c128] : memref<32x146xf32, #tpu.memory_space<vmem>>, vector<32x16xf32>
    tpu.vector_store %arg8[%c0_9, %c128], %1 {strides = array<i32>} : memref<32x146xf32, #tpu.memory_space<vmem>>, vector<32x16xf32>,
    %11 = vector.extract_strided_slice %7 {offsets = [0, 2], sizes = [32, 2], strides = [1, 1]} : vector<32x4xf32> to vector<32x2xf32>
    %c0_10 = arith.constant 0 : index
    %c144 = arith.constant 144 : index
    %12 = vector.load %arg8[%c0_10, %c144] : memref<32x146xf32, #tpu.memory_space<vmem>>, vector<32x2xf32>
    tpu.vector_store %arg8[%c0_10, %c144], %11 {strides = array<i32>} : memref<32x146xf32, #tpu.memory_space<vmem>>, vector<32x2xf32>,
    %c0_11 = arith.constant 0 : index
    %c126_12 = arith.constant 126 : index
    %13 = vector.load %arg8[%c0_11, %c126_12] : memref<32x146xf32, #tpu.memory_space<vmem>>, vector<32x16xf32>
    %14 = vector.extract_strided_slice %2 {offsets = [0, 0], sizes = [32, 1], strides = [1, 1]} : vector<32x5xf32> to vector<32x1xf32>
    %15 = vector.broadcast %14 : vector<32x1xf32> to vector<32x16xf32>
    %16 = arith.mulf %13, %15 : vector<32x16xf32>
    %17 = arith.addf %5, %16 : vector<32x16xf32>
    %c0_13 = arith.constant 0 : index
    %c127 = arith.constant 127 : index
    %18 = vector.load %arg8[%c0_13, %c127] : memref<32x146xf32, #tpu.memory_space<vmem>>, vector<32x16xf32>
    %19 = vector.extract_strided_slice %2 {offsets = [0, 1], sizes = [32, 1], strides = [1, 1]} : vector<32x5xf32> to vector<32x1xf32>
    %20 = vector.broadcast %19 : vector<32x1xf32> to vector<32x16xf32>
    %21 = arith.mulf %18, %20 : vector<32x16xf32>
    %22 = arith.addf %17, %21 : vector<32x16xf32>
    %c0_14 = arith.constant 0 : index
    %c129 = arith.constant 129 : index
    %23 = vector.load %arg8[%c0_14, %c129] : memref<32x146xf32, #tpu.memory_space<vmem>>, vector<32x16xf32>
    %24 = vector.extract_strided_slice %2 {offsets = [0, 3], sizes = [32, 1], strides = [1, 1]} : vector<32x5xf32> to vector<32x1xf32>
    %25 = vector.broadcast %24 : vector<32x1xf32> to vector<32x16xf32>
    %26 = arith.mulf %23, %25 : vector<32x16xf32>
    %27 = arith.addf %22, %26 : vector<32x16xf32>
    %c0_15 = arith.constant 0 : index
    %c130 = arith.constant 130 : index
    %28 = vector.load %arg8[%c0_15, %c130] : memref<32x146xf32, #tpu.memory_space<vmem>>, vector<32x16xf32>
    %29 = vector.extract_strided_slice %2 {offsets = [0, 4], sizes = [32, 1], strides = [1, 1]} : vector<32x5xf32> to vector<32x1xf32>
    %30 = vector.broadcast %29 : vector<32x1xf32> to vector<32x16xf32>
    %31 = arith.mulf %28, %30 : vector<32x16xf32>
    %32 = arith.addf %27, %31 : vector<32x16xf32>
    %c0_16 = arith.constant 0 : index
    %c0_17 = arith.constant 0 : index
    %33 = vector.load %arg5[%c0_16, %c0_17] : memref<64x32xf32, #tpu.memory_space<vmem>>, vector<64x32xf32>
    %cst = arith.constant dense<0.000000e+00> : vector<64x16xf32>
    %34 = tpu.matmul %33, %32, %cst {dimension_numbers = #tpu.dot_dimension_numbers<[1], [0], [0], [1], [0, 0, 1, 1], [], []>, precision = #tpu.contract_precision<fp32>} : vector<64x32xf32>, vector<32x16xf32>, vector<64x16xf32> -> vector<64x16xf32>
    %c0_18 = arith.constant 0 : index
    %c0_19 = arith.constant 0 : index
    %35 = vector.load %arg6[%c0_18, %c0_19] : memref<64x1xf32, #tpu.memory_space<vmem>>, vector<64x1xf32>
    %36 = vector.broadcast %35 : vector<64x1xf32> to vector<64x16xf32>
    %37 = arith.addf %34, %36 : vector<64x16xf32>
    %cst_20 = arith.constant 0.000000e+00 : f32
    %38 = vector.broadcast %cst_20 : f32 to vector<64x16xf32>
    %39 = arith.maximumf %37, %38 : vector<64x16xf32>
    %c0_21 = arith.constant 0 : index
    %c0_22 = arith.constant 0 : index
    %c0_23 = arith.constant 0 : index
    %40 = vector.load %arg7[%c0_21, %c0_22, %c0_23] : memref<1x64x16xf32, #tpu.memory_space<vmem>>, vector<1x64x16xf32>
    %41 = vector.shape_cast %40 : vector<1x64x16xf32> to vector<64x16xf32>
    %42 = vector.shape_cast %39 : vector<64x16xf32> to vector<1x64x16xf32>
    tpu.vector_store %arg7[%c0_21, %c0_22, %c0_23], %42 {strides = array<i32>} : memref<1x64x16xf32, #tpu.memory_space<vmem>>, vector<1x64x16xf32>,
    return
  }
  func.func @transform_0(%arg0: i32, %arg1: i32) -> (i32, i32, i32) {
    %c0_i32 = arith.constant 0 : i32
    %c0_i32_0 = arith.constant 0 : i32
    return %arg0, %c0_i32, %arg1 : i32, i32, i32
  }
  func.func @transform_1(%arg0: i32, %arg1: i32) -> (i32, i32, i32, i32) {
    %c0_i32 = arith.constant 0 : i32
    %c0_i32_0 = arith.constant 0 : i32
    %c0_i32_1 = arith.constant 0 : i32
    return %arg0, %arg1, %c0_i32, %c0_i32_0 : i32, i32, i32, i32
  }
  func.func @transform_2(%arg0: i32, %arg1: i32) -> (i32, i32) {
    %c0_i32 = arith.constant 0 : i32
    %c0_i32_0 = arith.constant 0 : i32
    %c0_i32_1 = arith.constant 0 : i32
    return %c0_i32, %c0_i32_0 : i32, i32
  }
  func.func @transform_3(%arg0: i32, %arg1: i32) -> (i32, i32) {
    %c0_i32 = arith.constant 0 : i32
    %c0_i32_0 = arith.constant 0 : i32
    %c0_i32_1 = arith.constant 0 : i32
    return %c0_i32, %c0_i32_0 : i32, i32
  }
  func.func @transform_4(%arg0: i32, %arg1: i32) -> (i32, i32) {
    %c0_i32 = arith.constant 0 : i32
    %c0_i32_0 = arith.constant 0 : i32
    %c0_i32_1 = arith.constant 0 : i32
    return %c0_i32, %c0_i32_0 : i32, i32
  }
  func.func @transform_5(%arg0: i32, %arg1: i32) -> (i32, i32, i32) {
    %c0_i32 = arith.constant 0 : i32
    %c0_i32_0 = arith.constant 0 : i32
    return %arg0, %c0_i32, %arg1 : i32, i32, i32
  }
}

</mosaic_0001>

<bundles_post_ra>
// kernel: tpu_custom_call.1
= control target key start
LH: loop header
LB: loop body
LE: loop exit
PB: predicated region body
PF: predicated region fallthrough
CT: control target
= control target key end

     0   :  { %s1885_s18 = smov 0   ;;  %s1887_s19 = smov 0   ;;  %s2271_s0 = inlined_call_operand.vmem [shape: f32[2,32,16], index: 0, kind: input, shape index: {}]   ;;  %s2272_s1 = inlined_call_operand.vmem [shape: f32[2,1,32,4], index: 1, kind: input, shape index: {}]   ;;  %s2273_s2 = inlined_call_operand.vmem [shape: f32[32,5], index: 2, kind: input, shape index: {}]   ;;  %s2274_s3 = inlined_call_operand.vmem [shape: f32[64,32], index: 3, kind: input, shape index: {}]   ;;  %s2275_s4 = inlined_call_operand.vmem [shape: f32[64,1], index: 4, kind: input, shape index: {}]   ;;  %s2276_s5 = inlined_call_operand.vmem [shape: f32[2,64,16], index: 5, kind: output, shape index: {}]  }
   0x1   :  { %s1889_s20 = smov 0  }
   0x2 LB: > { %s27_s21 = sadd.s32 1, %s1839_s19  ;;  %p1570_p0 = scmp.ge.s32.totalorder %s1843_s20, 1  ;;  %s1843_s20 = sphi %s1889_s20, %s15_s20   ;;  %s1839_s19 = sphi %s1887_s19, %s2278_s19   ;;  %s1835_s18 = sphi %s1885_s18, %s2277_s18  }
   0x3   : > { %p29_p1 = scmp.ge.s32.totalorder %s27_s21, 2  ;;  %p222_p2 = scmp.lt.s32.totalorder %s1843_s20, 3 }
   0x5   : > { %s2280_s21 = smov (%p29_p1, %s27_s21), 0  ;;  %p223_p3 = pnand %p1570_p0, %p222_p2 }
   0x6   : > { %p265_p4 = scmp.lt.s32.totalorder (!%p223_p3), %s1835_s18, 1  ;;  %s1847_s29 = smov (!%p223_p3), 126  }
   0x7   : > { %226 = sbr.rel (%p223_p3) target bundleno = 575 (0x23f), region = 40  ;;  %s1848_s30 = smov (!%p223_p3), 14  }
   0x8   : > { %s1852_s14 = smov (!%p223_p3), 2   ;;  %s1853_s15 = smov (!%p223_p3), 1  }
   0x9   : > { %s1854_s16 = smov (!%p223_p3), 127  }
   0xc   : > { %v1845_v0 = vmov 0   ;;  %v1846_v1 = vmov 1   ;;  %s2282_s18 = smov (!%p265_p4, %s1835_s18), 1  ;;  %vm347_vm0 = vcmask 130048   ;;  %v297_v7 = vld [vmem:[%s2273_s2 + $0x18] sm:$0xff]  ;;  %v296_v9 = vld [vmem:[%s2273_s2 + $0x10] sm:$0xff] }
   0xd   : > { %1808 = vset.pattern.permute.xlu0 %v1845_v0  ;;  %1809 = vset.pattern.permute.xlu1 %v1846_v1  ;;  %s1579_s22 = sshll.u32 %s2282_s18, 5  ;;  %v295_v12 = vld [vmem:[%s2273_s2 + $0x8] sm:$0xff]  ;;  %v294_v13 = vld [vmem:[%s2273_s2] sm:$0xff]  ;;  %v1849_v14 = vmov 3   ;;  %v1850_v15 = vmov 4   ;;  %v1851_v16 = vmov 2  }
   0xe   : > { %s281_s25 = scalar_lea.vmem %s2272_s1, %s1579_s22  ;;  %s272_s28 = scalar_lea.vmem %s2271_s0, %s1579_s22  ;;  %vm342_vm1 = vcmask 1048560   ;;  %vm364_vm2 = vcmask 146560   ;;  %v579_v60 = vld [vmem:[%s2274_s3] sm:$0xff]  ;;  %vm635_vm3 = vcmask 261120   ;;  %vm425_vm4 = vcmask 15360  }
   0xf   : > { %v325_v2 = vld [vmem:[%s281_s25 + $0x18] sm:$0xff]  ;;  %v324_v3 = vld [vmem:[%s281_s25 + $0x10] sm:$0xff]  ;;  %v1921_v6 = vld [vmem:[%s272_s28 + $0x8] sm:$0xff]  ;;  %v637_v61 = vsel %vm635_vm3, %v579_v60, 0  ;;  %vm486_vm5 = vcmask 7168   ;;  %s1581_s7 = sshll.u32 %s2282_s18, 6 }
  0x10   : > { %336 = vrot.lane.b32.xlu0 %v325_v2, %s1847_s29  ;;  %334 = vrot.lane.b32.xlu1 %v324_v3, %s1847_s29  ;;  %v1915_v4 = vld [vmem:[%s272_s28 + $0x10] sm:$0xff]  ;;  %v1919_v5 = vld [vmem:[%s272_s28 + $0x18] sm:$0xff]  ;;  %349 = vst.msk [vmem:[#allocation2 + $0x18] sm:$0xff] %vm347_vm0, %v1921_v6  ;;  %v1981_v62 = vand.u32 4294901760, %v637_v61  ;;  %s2241_s10 = scalar_lea.vmem %s2276_s5, %s1581_s7 }
  0x11   : > { %350 = vst.msk [vmem:[#allocation2 + $0x28] sm:$0xff] %vm347_vm0, %v1915_v4  ;;  %351 = vst.msk [vmem:[#allocation2 + $0x38] sm:$0xff] %vm347_vm0, %v1919_v5  ;;  %v323_v8 = vld [vmem:[%s281_s25 + $0x8] sm:$0xff]  ;;  %v322_v10 = vld [vmem:[%s281_s25] sm:$0xff] }
  0x12   : > { %v1934_v11 = vld [vmem:[%s272_s28] sm:$0xff]  ;;  %1682 = vmatprep.mubr.f32.mxu1 %v1981_v62 }
  0x13   : > { %348 = vst.msk [vmem:[#allocation2 + $0x8] sm:$0xff] %vm347_vm0, %v1934_v11 }
  0x14   : > { %358 = vrot.lane.b32.xlu0 %v325_v2, %s1848_s30  ;;  %356 = vrot.lane.b32.xlu1 %v324_v3, %s1848_s30  ;;  %v1984_v2 = vsub.f32 %v637_v61, %v1981_v62  ;;  %v582_v61 = vld [vmem:[%s2274_s3 + $0x18] sm:$0xff] }
  0x16   : > { %v731_v3 = vand.u32 4294901760, %v1984_v2 }
  0x18   : > { %390 = vperm.xlu0 %1808, %v297_v7   ;;  %332 = vrot.lane.b32.xlu1 %v323_v8, %s1847_s29 }
  0x1c   : > { %386 = vperm.xlu0 %1808, %v296_v9   ;;  %354 = vrot.lane.b32.xlu1 %v323_v8, %s1848_s30 }
  0x20   : > { %451 = vperm.xlu1 %1809, %v297_v7   ;;  %330 = vrot.lane.b32.xlu0 %v322_v10, %s1847_s29 }
  0x24   : > { %352 = vrot.lane.b32.xlu1 %v322_v10, %s1848_s30  ;;  %382 = vperm.xlu0 %1808, %v295_v12   ;;  %v732_v10 = vsub.f32 %v1984_v2, %v731_v3 }
  0x28   : > { %447 = vperm.xlu1 %1809, %v296_v9   ;;  %1813 = vset.pattern.permute.xlu0 %v1846_v1 }
  0x29   : > { %439 = vperm.xlu0 %1813, %v294_v13  }
  0x2c   : > { %1810 = vset.pattern.permute.xlu1 %v1845_v0 }
  0x2d   : > { %378 = vperm.xlu1 %1810, %v294_v13   ;;  %1814 = vset.pattern.permute.xlu0 %v1849_v14 }
  0x2e   : > { %512 = vperm.xlu0 %1814, %v297_v7  }
  0x31   : > { %1811 = vset.pattern.permute.xlu1 %v1846_v1 }
  0x32   : > { %443 = vperm.xlu1 %1811, %v295_v12   ;;  %508 = vperm.xlu0 %1814, %v296_v9  }
  0x36   : > { %1812 = vset.pattern.permute.xlu1 %v1850_v15  ;;  %500 = vperm.xlu0 %1814, %v294_v13  }
  0x37   : > { %552 = vperm.xlu1 %1812, %v297_v7  }
  0x3a   : > { %1817 = vset.pattern.permute.xlu0 %v1851_v16 }
  0x3b   : > { %1815 = vset.pattern.permute.xlu1 %v1849_v14  ;;  %315 = vperm.xlu0 %1817, %v297_v7   ;;  %v733_v14 = vand.u32 4294901760, %v732_v10  ;;  %v646_v10 = vsel %vm635_vm3, %v582_v61, 0 }
  0x3c   : > { %504 = vperm.xlu1 %1815, %v295_v12  }
  0x3d   : > { %1662 = vmatprep.mubr.f32.mxu0 %v733_v14 }
  0x3f   : > { %300 = vperm.xlu0 %1817, %v294_v13  }
  0x40   : > { %1816 = vset.pattern.permute.xlu1 %v1850_v15 }
  0x41   : > { %548 = vperm.xlu1 %1816, %v296_v9  }
  0x43   : > { %1820 = vset.pattern.permute.xlu0 %v1845_v0 }
  0x45   : > { %544 = vperm.xlu1 %1816, %v295_v12  }
  0x49   : > { %540 = vperm.xlu1 %1816, %v294_v13  }
  0x4d   : > { %1818 = vset.pattern.permute.xlu1 %v1851_v16 }
  0x4e   : > { %310 = vperm.xlu1 %1818, %v296_v9  }
  0x52   : > { %305 = vperm.xlu1 %1818, %v295_v12  }
  0x56   : > { %1819 = vset.pattern.permute.xlu1 %v1845_v0 }
  0x82   : > { %v335_v17 = vpop.permute.xlu1 %334  ;;  %v337_v18 = vpop.permute.xlu0 %336 }
  0x83   : > { %345 = vst.msk [vmem:[#allocation2 + $0x20] sm:$0xff] %vm342_vm1, %v335_v17  ;;  %346 = vst.msk [vmem:[#allocation2 + $0x30] sm:$0xff] %vm342_vm1, %v337_v18 }
  0x86   : > { %v357_v19 = vpop.permute.xlu1 %356  ;;  %v359_v20 = vpop.permute.xlu0 %358 }
  0x87   : > { %367 = vst.msk [vmem:[#allocation2 + $0x28] sm:$0xff] %vm364_vm2, %v357_v19  ;;  %368 = vst.msk [vmem:[#allocation2 + $0x38] sm:$0xff] %vm364_vm2, %v359_v20  ;;  %v587_v20 = vld [vmem:[%s2275_s4] sm:$0xff] }
  0x8a   : > { %v333_v21 = vpop.permute.xlu1 %332  ;;  %v375_v23 = vld [vmem:[#allocation2 + $0x30] sm:$0xff]  ;;  %v373_v29 = vld [vmem:[#allocation2 + $0x20] sm:$0xff] }
  0x8b   : > { %344 = vst.msk [vmem:[#allocation2 + $0x10] sm:$0xff] %vm342_vm1, %v333_v21  ;;  %v588_v21 = vld [vmem:[%s2275_s4 + $0x8] sm:$0xff] }
  0x8e   : > { %v355_v22 = vpop.permute.xlu1 %354  ;;  %v376_v25 = vld [vmem:[#allocation2 + $0x38] sm:$0xff]  ;;  %v1956_v30 = vld [vmem:[#allocation2 + $0x28] sm:$0xff] }
  0x8f   : > { %366 = vst.msk [vmem:[#allocation2 + $0x18] sm:$0xff] %vm364_vm2, %v355_v22  ;;  %v589_v22 = vld [vmem:[%s2275_s4 + $0x10] sm:$0xff] }
  0x92   : > { %v371_v38 = vld [vmem:[#allocation2 + $0x10] sm:$0xff] }
  0x93   : > { %v391_v24 = vpop.permute.xlu0 %390 }
  0x94   : > { %v399_v26 = vmul.f32 %v391_v24, %v375_v23  ;;  %v400_v27 = vmul.f32 %v391_v24, %v376_v25 }
  0x96   : > { %421 = vrot.lane.b32.xlu1 %v399_v26, %s1852_s14  ;;  %423 = vrot.lane.b32.xlu0 %v400_v27, %s1852_s14  ;;  %v372_v40 = vld [vmem:[#allocation2 + $0x18] sm:$0xff]  ;;  %v593_v27 = vld [vmem:[%s2275_s4 + $0x30] sm:$0xff] }
  0x97   : > { %v387_v28 = vpop.permute.xlu0 %386  ;;  %v590_v26 = vld [vmem:[%s2275_s4 + $0x18] sm:$0xff] }
  0x98   : > { %v397_v31 = vmul.f32 %v387_v28, %v373_v29  ;;  %v398_v32 = vmul.f32 %v387_v28, %v1956_v30  ;;  %v592_v28 = vld [vmem:[%s2275_s4 + $0x28] sm:$0xff] }
  0x9a   : > { %417 = vrot.lane.b32.xlu1 %v397_v31, %s1852_s14  ;;  %419 = vrot.lane.b32.xlu0 %v398_v32, %s1852_s14  ;;  %v594_v31 = vld [vmem:[%s2275_s4 + $0x38] sm:$0xff] }
  0x9b   : > { %v452_v33 = vpop.permute.xlu1 %451  ;;  %v331_v34 = vpop.permute.xlu0 %330 }
  0x9c   : > { %v460_v35 = vmul.f32 %v452_v33, %v375_v23  ;;  %v461_v36 = vmul.f32 %v452_v33, %v376_v25  ;;  %343 = vst.msk [vmem:[#allocation2] sm:$0xff] %vm342_vm1, %v331_v34  ;;  %v591_v23 = vld [vmem:[%s2275_s4 + $0x20] sm:$0xff] }
  0x9e   : > { %482 = vrot.lane.b32.xlu1 %v460_v35, %s1853_s15  ;;  %484 = vrot.lane.b32.xlu0 %v461_v36, %s1853_s15 }
  0x9f   : > { %v353_v37 = vpop.permute.xlu1 %352  ;;  %v383_v39 = vpop.permute.xlu0 %382 }
  0xa0   : > { %365 = vst.msk [vmem:[#allocation2 + $0x8] sm:$0xff] %vm364_vm2, %v353_v37  ;;  %v395_v41 = vmul.f32 %v383_v39, %v371_v38  ;;  %v396_v42 = vmul.f32 %v383_v39, %v372_v40 }
  0xa2   : > { %413 = vrot.lane.b32.xlu1 %v395_v41, %s1852_s14  ;;  %415 = vrot.lane.b32.xlu0 %v396_v42, %s1852_s14 }
  0xa3   : > { %v448_v43 = vpop.permute.xlu1 %447  ;;  %v369_v47 = vld [vmem:[#allocation2] sm:$0xff] }
  0xa4   : > { %v458_v44 = vmul.f32 %v448_v43, %v373_v29  ;;  %v459_v45 = vmul.f32 %v448_v43, %v1956_v30  ;;  %v440_v46 = vpop.permute.xlu0 %439 }
  0xa5   : > { %v454_v63 = vmul.f32 %v440_v46, %v369_v47 }
  0xa6   : > { %478 = vrot.lane.b32.xlu1 %v458_v44, %s1853_s15  ;;  %480 = vrot.lane.b32.xlu0 %v459_v45, %s1853_s15 }
  0xa7   : > { %v370_v52 = vld [vmem:[#allocation2 + $0x8] sm:$0xff] }
  0xa8   : > { %v379_v48 = vpop.permute.xlu1 %378  ;;  %v455_v7 = vmul.f32 %v440_v46, %v370_v52 }
  0xa9   : > { %v393_v49 = vmul.f32 %v379_v48, %v369_v47  ;;  %v513_v50 = vpop.permute.xlu0 %512  ;;  %v394_v54 = vmul.f32 %v379_v48, %v370_v52 }
  0xaa   : > { %v518_v51 = vmul.f32 %v513_v50, %v376_v25 }
  0xab   : > { %409 = vrot.lane.b32.xlu0 %v393_v49, %s1852_s14  ;;  %v580_v49 = vld [vmem:[%s2274_s3 + $0x8] sm:$0xff] }
  0xac   : > { %529 = vrot.lane.b32.xlu1 %v518_v51, %s1854_s16 }
  0xad   : > { %v444_v53 = vpop.permute.xlu1 %443  ;;  %v509_v56 = vpop.permute.xlu0 %508 }
  0xae   : > { %v456_v55 = vmul.f32 %v444_v53, %v371_v38  ;;  %v457_v57 = vmul.f32 %v444_v53, %v372_v40  ;;  %v517_v58 = vmul.f32 %v509_v56, %v1956_v30  ;;  %v581_v53 = vld [vmem:[%s2274_s3 + $0x10] sm:$0xff] }
  0xb0   : > { %474 = vrot.lane.b32.xlu0 %v456_v55, %s1853_s15  ;;  %411 = vrot.lane.b32.xlu1 %v394_v54, %s1852_s14  ;;  %v640_v55 = vsel %vm635_vm3, %v580_v49, 0 }
  0xb1   : > { %v501_v9 = vpop.permute.xlu0 %500  ;;  %v2036_v60 = vand.u32 4294901760, %v640_v55 }
  0xb2   : > { %v553_v59 = vpop.permute.xlu1 %552  ;;  %v515_v15 = vmul.f32 %v501_v9, %v370_v52 }
  0xb3   : > { %v558_v0 = vmul.f32 %v553_v59, %v376_v25 }
  0xb4   : > { %527 = vrot.lane.b32.xlu0 %v517_v58, %s1854_s16  ;;  %476 = vrot.lane.b32.xlu1 %v457_v57, %s1853_s15  ;;  %v643_v57 = vsel %vm635_vm3, %v581_v53, 0 }
  0xb6   : > { %v316_v25 = vpop.permute.xlu0 %315 }
  0xb7   : > { %v505_v1 = vpop.permute.xlu1 %504  ;;  %v321_v47 = vmul.f32 %v316_v25, %v1919_v5 }
  0xb8   : > { %470 = vrot.lane.b32.xlu0 %v454_v63, %s1853_s15  ;;  %569 = vrot.lane.b32.xlu1 %v558_v0, %s1847_s29  ;;  %v516_v8 = vmul.f32 %v505_v1, %v372_v40 }
  0xbc   : > { %v549_v12 = vpop.permute.xlu1 %548  ;;  %525 = vrot.lane.b32.xlu0 %v516_v8, %s1854_s16  ;;  %472 = vrot.lane.b32.xlu1 %v455_v7, %s1853_s15  ;;  %v2043_v7 = vand.u32 4294901760, %v643_v57 }
  0xbd   : > { %v557_v13 = vmul.f32 %v549_v12, %v1956_v30  ;;  %v301_v30 = vpop.permute.xlu0 %300  ;;  %v583_v12 = vld [vmem:[%s2274_s3 + $0x20] sm:$0xff] }
  0xc0   : > { %v545_v16 = vpop.permute.xlu1 %544  ;;  %523 = vrot.lane.b32.xlu0 %v515_v15, %s1854_s16  ;;  %567 = vrot.lane.b32.xlu1 %v557_v13, %s1847_s29  ;;  %v318_v13 = vmul.f32 %v301_v30, %v1934_v11  ;;  %v584_v11 = vld [vmem:[%s2274_s3 + $0x28] sm:$0xff] }
  0xc1   : > { %v556_v17 = vmul.f32 %v545_v16, %v372_v40 }
  0xc4   : > { %v541_v18 = vpop.permute.xlu1 %540  ;;  %565 = vrot.lane.b32.xlu1 %v556_v17, %s1847_s29 }
  0xc5   : > { %v555_v19 = vmul.f32 %v541_v18, %v370_v52 }
  0xc7   : > { %563 = vrot.lane.b32.xlu0 %v555_v19, %s1847_s29 }
  0xc8   : > { %597 = vperm.xlu1 %1819, %v587_v20  }
  0xc9   : > { %v311_v24 = vpop.permute.xlu1 %310 }
  0xca   : > { %v320_v63 = vmul.f32 %v311_v24, %v1915_v4  ;;  %v2054_v4 = vsub.f32 %v640_v55, %v2036_v60 }
  0xcb   : > { %602 = vperm.xlu0 %1820, %v588_v21  }
  0xcc   : > { %607 = vperm.xlu1 %1819, %v589_v22   ;;  %v2068_v22 = vsub.f32 %v643_v57, %v2043_v7 }
  0xcd   : > { %v306_v29 = vpop.permute.xlu1 %305 }
  0xce   : > { %v319_v16 = vmul.f32 %v306_v29, %v1921_v6  ;;  %v2070_v6 = vand.u32 4294901760, %v646_v10 }
  0xcf   : > { %617 = vperm.xlu0 %1820, %v591_v23   ;;  %v649_v23 = vsel %vm635_vm3, %v583_v12, 0 }
  0xd0   : > { %612 = vperm.xlu1 %1819, %v590_v26  }
  0xd3   : > { %627 = vperm.xlu0 %1820, %v593_v27  }
  0xd4   : > { %622 = vperm.xlu1 %1819, %v592_v28   ;;  %v585_v28 = vld [vmem:[%s2274_s3 + $0x30] sm:$0xff] }
  0xd8   : > { %632 = vperm.xlu1 %1819, %v594_v31   ;;  %v741_v31 = vand.u32 4294901760, %v2054_v4 }
 0x108   : > { %v422_v32 = vpop.permute.xlu1 %421  ;;  %v424_v33 = vpop.permute.xlu0 %423 }
 0x109   : > { %v429_v44 = vsel %vm425_vm4, %v422_v32, %v424_v33  ;;  %v652_v32 = vsel %vm635_vm3, %v584_v11, 0 }
 0x10a   : > { %v437_v50 = vadd.f32 %v429_v44, %v321_v47 }
 0x10c   : > { %v418_v34 = vpop.permute.xlu1 %417  ;;  %v420_v35 = vpop.permute.xlu0 %419 }
 0x10d   : > { %v428_v5 = vsel %vm425_vm4, %v418_v34, %v420_v35 }
 0x10e   : > { %v436_v8 = vadd.f32 %v428_v5, %v320_v63 }
 0x110   : > { %v483_v36 = vpop.permute.xlu1 %482  ;;  %v485_v37 = vpop.permute.xlu0 %484 }
 0x111   : > { %v490_v48 = vsel %vm486_vm5, %v483_v36, %v485_v37  ;;  %v2084_v36 = vand.u32 4294901760, %v649_v23  ;;  %v586_v37 = vld [vmem:[%s2274_s3 + $0x38] sm:$0xff] }
 0x112   : > { %v498_v54 = vadd.f32 %v490_v48, %v437_v50  ;;  %v658_v48 = vsel %vm635_vm3, %v586_v37, 0 }
 0x113   : > { %v2121_v61 = vand.u32 4294901760, %v658_v48 }
 0x114   : > { %v414_v38 = vpop.permute.xlu1 %413  ;;  %v416_v39 = vpop.permute.xlu0 %415 }
 0x115   : > { %v427_v14 = vsel %vm425_vm4, %v414_v38, %v416_v39  ;;  %v751_v39 = vand.u32 4294901760, %v2068_v22 }
 0x116   : > { %v435_v24 = vadd.f32 %v427_v14, %v319_v16 }
 0x117   : > { %v752_v55 = vsub.f32 %v2068_v22, %v751_v39 }
 0x118   : > { %v481_v40 = vpop.permute.xlu0 %480  ;;  %v479_v41 = vpop.permute.xlu1 %478 }
 0x119   : > { %v489_v1 = vsel %vm486_vm5, %v479_v41, %v481_v40  ;;  %v2091_v40 = vsub.f32 %v646_v10, %v2070_v6  ;;  %v655_v41 = vsel %vm635_vm3, %v585_v28, 0  ;;  %v753_v14 = vand.u32 4294901760, %v752_v55 }
 0x11a   : > { %v497_v18 = vadd.f32 %v489_v1, %v436_v8 }
 0x11d   : > { %v410_v42 = vpop.permute.xlu0 %409 }
 0x11e   : > { %v530_v43 = vpop.permute.xlu1 %529 }
 0x11f   : > { %v538_v56 = vadd.f32 %v530_v43, %v498_v54  ;;  %v742_v54 = vsub.f32 %v2054_v4, %v741_v31 }
 0x122   : > { %v475_v45 = vpop.permute.xlu0 %474  ;;  %v412_v46 = vpop.permute.xlu1 %411 }
 0x123   : > { %v426_v17 = vsel %vm425_vm4, %v410_v42, %v412_v46  ;;  %v2096_v46 = vand.u32 4294901760, %v652_v32 }
 0x124   : > { %v434_v29 = vadd.f32 %v426_v17, %v318_v13  ;;  %v743_v13 = vand.u32 4294901760, %v742_v54 }
 0x126   : > { %v528_v51 = vpop.permute.xlu0 %527  ;;  %v477_v52 = vpop.permute.xlu1 %476 }
 0x127   : > { %v488_v21 = vsel %vm486_vm5, %v475_v45, %v477_v52  ;;  %v537_v25 = vadd.f32 %v528_v51, %v497_v18  ;;  %v2102_v51 = vsub.f32 %v649_v23, %v2084_v36  ;;  %v2104_v52 = vand.u32 4294901760, %v655_v41 }
 0x128   : > { %v496_v33 = vadd.f32 %v488_v21, %v435_v24 }
 0x129   : > { %v771_v8 = vand.u32 4294901760, %v2102_v51  ;;  %v2128_v10 = vsub.f32 %v655_v41, %v2104_v52 }
 0x12a   : > { %v471_v58 = vpop.permute.xlu0 %470  ;;  %v570_v59 = vpop.permute.xlu1 %569 }
 0x12b   : > { %v578_v0 = vadd.f32 %v570_v59, %v538_v56  ;;  %v761_v56 = vand.u32 4294901760, %v2091_v40  ;;  %v2119_v59 = vsub.f32 %v652_v32, %v2096_v46  ;;  %v772_v23 = vsub.f32 %v2102_v51, %v771_v8 }
 0x12c   : > { %v791_v24 = vand.u32 4294901760, %v2128_v10 }
 0x12d   : > { %v2045_v9 = vand.u32 4294901760, %v578_v0  ;;  %v781_v18 = vand.u32 4294901760, %v2119_v59 }
 0x12e   : > { %v473_v15 = vpop.permute.xlu1 %472  ;;  %v526_v20 = vpop.permute.xlu0 %525 }
 0x12f   : > { %v2059_v19 = vsub.f32 %v578_v0, %v2045_v9  ;;  %1654 = vmatprep.subr.mxu0 %v2045_v9  ;;  %v487_v26 = vsel %vm486_vm5, %v471_v58, %v473_v15  ;;  %v536_v42 = vadd.f32 %v526_v20, %v496_v33  ;;  %v762_v15 = vsub.f32 %v2091_v40, %v761_v56 }
 0x130   : > { %1655 = vmatpush3.msra.mxu0 %v2045_v9  ;;  %v495_v38 = vadd.f32 %v487_v26, %v434_v29  ;;  %v2140_v20 = vsub.f32 %v658_v48, %v2121_v61  ;;  %v782_v29 = vsub.f32 %v2119_v59, %v781_v18  ;;  %v773_v33 = vand.u32 4294901760, %v772_v23 }
 0x131   : > { %v2075_v27 = vand.u32 4294901760, %v2059_v19  ;;  %v763_v28 = vand.u32 4294901760, %v762_v15 }
 0x132   : > { %v568_v30 = vpop.permute.xlu1 %567  ;;  %v524_v43 = vpop.permute.xlu0 %523  ;;  %v783_v37 = vand.u32 4294901760, %v782_v29 }
 0x133   : > { %v577_v34 = vadd.f32 %v568_v30, %v537_v25  ;;  %v837_v35 = vsub.f32 %v2059_v19, %v2075_v27  ;;  %v535_v53 = vadd.f32 %v524_v43, %v495_v38  ;;  %v801_v30 = vand.u32 4294901760, %v2140_v20 }
 0x135   : > { %v2094_v44 = vand.u32 4294901760, %v577_v34  ;;  %v838_v45 = vand.u32 4294901760, %v837_v35  ;;  %v802_v38 = vsub.f32 %v2140_v20, %v801_v30 }
 0x136   : > { %v566_v47 = vpop.permute.xlu1 %565 }
 0x137   : > { %v842_v49 = vsub.f32 %v577_v34, %v2094_v44  ;;  %v576_v50 = vadd.f32 %v566_v47, %v536_v42  ;;  %1656 = vmatprep.subr.mxu0 %v2094_v44  ;;  %1674 = vmatprep.subr.mxu1 %v838_v45  ;;  %v792_v34 = vsub.f32 %v2128_v10, %v791_v24  ;;  %v803_v41 = vand.u32 4294901760, %v802_v38 }
 0x138   : > { %1657 = vmatpush3.msra.mxu0 %v2094_v44  ;;  %1675 = vmatpush3.msra.mxu1 %v838_v45 }
 0x139   : > { %v2114_v57 = vand.u32 4294901760, %v576_v50  ;;  %v564_v5 = vpop.permute.xlu0 %563  ;;  %v2116_v58 = vand.u32 4294901760, %v842_v49 }
 0x13a   : > { %v575_v63 = vadd.f32 %v564_v5, %v535_v53 }
 0x13b   : > { %v849_v0 = vsub.f32 %v576_v50, %v2114_v57  ;;  %1658 = vmatprep.subr.mxu0 %v2114_v57  ;;  %v844_v1 = vsub.f32 %v842_v49, %v2116_v58 }
 0x13c   : > { %v2130_v12 = vand.u32 4294901760, %v575_v63  ;;  %1659 = vmatpush3.msra.mxu0 %v2114_v57 }
 0x13d   : > { %v845_v16 = vand.u32 4294901760, %v844_v1  ;;  %v2136_v17 = vand.u32 4294901760, %v849_v0 }
 0x13e   : > { %v856_v11 = vsub.f32 %v575_v63, %v2130_v12  ;;  %1660 = vmatprep.subr.mxu0 %v2130_v12 }
 0x13f   : > { %1661 = vmatpush3.msra.mxu0 %v2130_v12  ;;  %1676 = vmatprep.subr.mxu1 %v845_v16  ;;  %v851_v21 = vsub.f32 %v849_v0, %v2136_v17 }
 0x140   : > { %1663 = vmatmul.mubr.f32.vlgmr.msra.gmra.mxu0 %v743_v13  ;;  %1677 = vmatpush3.msra.mxu1 %v845_v16  ;;  %v857_v25 = vand.u32 4294901760, %v856_v11 }
 0x141   : > { %1694 = vmatprep.subr.mxu0 %v2059_v19  ;;  %1665 = vmatprep.mubr.f32.mxu0 %v753_v14  ;;  %v852_v26 = vand.u32 4294901760, %v851_v21 }
 0x142   : > { %1695 = vmatpush3.msra.mxu0 %v2059_v19  ;;  %v858_v32 = vsub.f32 %v856_v11, %v857_v25  ;;  %v793_v19 = vand.u32 4294901760, %v792_v34 }
 0x143   : > { %1696 = vmatprep.subr.mxu0 %v842_v49  ;;  %1678 = vmatprep.subr.mxu1 %v852_v26 }
 0x144   : > { %1697 = vmatpush3.msra.mxu0 %v842_v49  ;;  %1679 = vmatpush3.msra.mxu1 %v852_v26  ;;  %v859_v35 = vand.u32 4294901760, %v858_v32 }
 0x145   : > { %1666 = vmatmul.mubr.f32.gmra.mxu0 %v763_v28  ;;  %1698 = vmatprep.subr.mxu0 %v849_v0 }
 0x146   : > { %1699 = vmatpush3.msra.mxu0 %v849_v0  ;;  %1680 = vmatprep.subr.mxu1 %v859_v35  ;;  %v603_v55 = vpop.permute.xlu0 %602 }
 0x147   : > { %1700 = vmatprep.subr.mxu0 %v856_v11  ;;  %1668 = vmatprep.mubr.f32.mxu0 %v773_v33 }
 0x148   : > { %1681 = vmatpush3.msra.mxu1 %v859_v35  ;;  %1701 = vmatpush3.msra.mxu0 %v856_v11 }
 0x149   : > { %1669 = vmatmul.mubr.f32.gmra.mxu0 %v783_v37  ;;  %1683 = vmatmul.mubr.f32.vlgmr.msra.gmra.mxu1 %v2036_v60 }
 0x14a   : > { %1714 = vmatprep.subr.mxu1 %v2045_v9  ;;  %1734 = vmatprep.subr.mxu0 %v2075_v27  ;;  %v618_v15 = vpop.permute.xlu0 %617 }
 0x14b   : > { %1715 = vmatpush3.msra.mxu1 %v2045_v9  ;;  %1671 = vmatprep.mubr.f32.mxu0 %v793_v19 }
 0x14c   : > { %1716 = vmatprep.subr.mxu1 %v2094_v44  ;;  %1685 = vmatprep.mubr.f32.mxu1 %v2043_v7 }
 0x14d   : > { %1717 = vmatpush3.msra.mxu1 %v2094_v44  ;;  %1672 = vmatmul.mubr.f32.gmra.mxu0 %v803_v41 }
 0x14e   : > { %1686 = vmatmul.mubr.f32.gmra.mxu1 %v2070_v6  ;;  %1718 = vmatprep.subr.mxu1 %v2114_v57  ;;  %v628_v41 = vpop.permute.xlu0 %627 }
 0x14f   : > { %1719 = vmatpush3.msra.mxu1 %v2114_v57  ;;  %1688 = vmatprep.mubr.f32.mxu1 %v2084_v36 }
 0x150   : > { %1720 = vmatprep.subr.mxu1 %v2130_v12  ;;  %1702 = vmatprep.mubr.f32.mxu0 %v1984_v2 }
 0x151   : > { %1721 = vmatpush3.msra.mxu1 %v2130_v12  ;;  %1703 = vmatmul.mubr.f32.vlgmr.msra.gmra.mxu0 %v2054_v4 }
 0x152   : > { %1689 = vmatmul.mubr.f32.gmra.mxu1 %v2096_v46  ;;  %1735 = vmatpush3.msra.mxu0 %v2075_v27 }
 0x153   : > { %1754 = vmatprep.subr.mxu1 %v2045_v9  ;;  %1736 = vmatprep.subr.mxu0 %v2116_v58 }
 0x154   : > { %1737 = vmatpush3.msra.mxu0 %v2116_v58  ;;  %1691 = vmatprep.mubr.f32.mxu1 %v2104_v52 }
 0x155   : > { %1705 = vmatprep.mubr.f32.mxu0 %v2068_v22  ;;  %1738 = vmatprep.subr.mxu0 %v2136_v17 }
 0x156   : > { %1692 = vmatmul.mubr.f32.gmra.mxu1 %v2121_v61  ;;  %1706 = vmatmul.mubr.f32.gmra.mxu0 %v2091_v40 }
 0x157   : > { %1739 = vmatpush3.msra.mxu0 %v2136_v17  ;;  %1708 = vmatprep.mubr.f32.mxu0 %v2102_v51 }
 0x158   : > { %1740 = vmatprep.subr.mxu0 %v857_v25  ;;  %1722 = vmatprep.mubr.f32.mxu1 %v731_v3 }
 0x159   : > { %1741 = vmatpush3.msra.mxu0 %v857_v25 }
 0x15a   : > { %1709 = vmatmul.mubr.f32.gmra.mxu0 %v2119_v59  ;;  %1723 = vmatmul.mubr.f32.vlgmr.msra.gmra.mxu1 %v741_v31 }
 0x15b   : > { %1755 = vmatpush3.msra.mxu1 %v2045_v9  ;;  %1711 = vmatprep.mubr.f32.mxu0 %v2128_v10 }
 0x15c   : > { %1756 = vmatprep.subr.mxu1 %v2094_v44  ;;  %1725 = vmatprep.mubr.f32.mxu1 %v751_v39  ;;  %v598_v39 = vpop.permute.xlu1 %597 }
 0x15d   : > { %1757 = vmatpush3.msra.mxu1 %v2094_v44 }
 0x15e   : > { %1758 = vmatprep.subr.mxu1 %v2114_v57  ;;  %1712 = vmatmul.mubr.f32.gmra.mxu0 %v2140_v20 }
 0x15f   : > { %1726 = vmatmul.mubr.f32.gmra.mxu1 %v761_v56  ;;  %1742 = vmatprep.mubr.f32.mxu0 %v1981_v62 }
 0x160   : > { %1759 = vmatpush3.msra.mxu1 %v2114_v57  ;;  %1728 = vmatprep.mubr.f32.mxu1 %v771_v8  ;;  %v608_v45 = vpop.permute.xlu1 %607 }
 0x161   : > { %1760 = vmatprep.subr.mxu1 %v2130_v12 }
 0x162   : > { %1761 = vmatpush3.msra.mxu1 %v2130_v12  ;;  %1743 = vmatmul.mubr.f32.vlgmr.msra.gmra.mxu0 %v2036_v60 }
 0x163   : > { %1729 = vmatmul.mubr.f32.gmra.mxu1 %v781_v18  ;;  %1745 = vmatprep.mubr.f32.mxu0 %v2043_v7 }
 0x164   : > { %1731 = vmatprep.mubr.f32.mxu1 %v791_v24 }
 0x166   : > { %1746 = vmatmul.mubr.f32.gmra.mxu0 %v2070_v6 }
 0x167   : > { %1732 = vmatmul.mubr.f32.gmra.mxu1 %v801_v30  ;;  %1748 = vmatprep.mubr.f32.mxu0 %v2084_v36 }
 0x168   : > { %1762 = vmatprep.mubr.f32.mxu1 %v1981_v62 }
 0x16a   : > { %1749 = vmatmul.mubr.f32.gmra.mxu0 %v2096_v46 }
 0x16b   : > { %1763 = vmatmul.mubr.f32.vlgmr.msra.gmra.mxu1 %v2036_v60  ;;  %1751 = vmatprep.mubr.f32.mxu0 %v2104_v52 }
 0x16c   : > { %1765 = vmatprep.mubr.f32.mxu1 %v2043_v7 }
 0x16e   : > { %1752 = vmatmul.mubr.f32.gmra.mxu0 %v2121_v61 }
 0x16f   : > { %1766 = vmatmul.mubr.f32.gmra.mxu1 %v2070_v6 }
 0x170   : > { %1768 = vmatprep.mubr.f32.mxu1 %v2084_v36 }
 0x173   : > { %1769 = vmatmul.mubr.f32.gmra.mxu1 %v2096_v46 }
 0x174   : > { %1771 = vmatprep.mubr.f32.mxu1 %v2104_v52  ;;  %v613_v52 = vpop.permute.xlu1 %612 }
 0x177   : > { %1772 = vmatmul.mubr.f32.gmra.mxu1 %v2121_v61 }
 0x178   : > { %v623_v61 = vpop.permute.xlu1 %622 }
 0x17c   : > { %v633_v24 = vpop.permute.xlu1 %632 }
 0x200   : > { %v1664_v62 = vpop.f32.mrf.mxu0 }
 0x201   : > { %v746_v5 = vadd.f32 %v1664_v62, %v603_v55 }
 0x202   : > { %v735_v2 = vpop.f32.mrf.mxu0 }
 0x203   : > { %v736_v1 = vadd.f32 %v735_v2, %v598_v39 }
 0x205   : > { %v1667_v3 = vpop.f32.mrf.mxu0 }
 0x206   : > { %v766_v10 = vadd.f32 %v1667_v3, %v613_v52 }
 0x207   : > { %v755_v60 = vpop.f32.mrf.mxu0 }
 0x208   : > { %v756_v11 = vadd.f32 %v755_v60, %v608_v45 }
 0x209   : > { %v1670_v9 = vpop.f32.mrf.mxu0  ;;  %v1684_v4 = vpop.f32.mrf.mxu1 }
 0x20a   : > { %v903_v8 = vadd.f32 %v1684_v4, %v746_v5  ;;  %v786_v18 = vadd.f32 %v1670_v9, %v623_v61 }
 0x20b   : > { %v775_v22 = vpop.f32.mrf.mxu0  ;;  %v896_v7 = vpop.f32.mrf.mxu1 }
 0x20c   : > { %v897_v14 = vadd.f32 %v896_v7, %v736_v1  ;;  %v776_v35 = vadd.f32 %v775_v22, %v618_v15 }
 0x20d   : > { %v1673_v27 = vpop.f32.mrf.mxu0 }
 0x20e   : > { %v1687_v31 = vpop.f32.mrf.mxu1  ;;  %v806_v38 = vadd.f32 %v1673_v27, %v633_v24 }
 0x20f   : > { %v2231_v6 = vpop.f32.mrf.mxu0  ;;  %v915_v21 = vadd.f32 %v1687_v31, %v766_v10 }
 0x210   : > { %v908_v36 = vpop.f32.mrf.mxu1 }
 0x211   : > { %v1704_v40 = vpop.f32.mrf.mxu0  ;;  %v909_v29 = vadd.f32 %v908_v36, %v756_v11 }
 0x212   : > { %v1690_v42 = vpop.f32.mrf.mxu1  ;;  %v1026_v16 = vadd.f32 %v1704_v40, %v903_v8  ;;  %v796_v40 = vadd.f32 %v2231_v6, %v628_v41 }
 0x213   : > { %v1018_v43 = vpop.f32.mrf.mxu0  ;;  %v927_v37 = vadd.f32 %v1690_v42, %v786_v18 }
 0x214   : > { %v920_v44 = vpop.f32.mrf.mxu1  ;;  %v1019_v23 = vadd.f32 %v1018_v43, %v897_v14 }
 0x215   : > { %v921_v9 = vadd.f32 %v920_v44, %v776_v35 }
 0x216   : > { %v1693_v46 = vpop.f32.mrf.mxu1  ;;  %v1707_v47 = vpop.f32.mrf.mxu0 }
 0x217   : > { %v1040_v30 = vadd.f32 %v1707_v47, %v915_v21  ;;  %v939_v42 = vadd.f32 %v1693_v46, %v806_v38 }
 0x218   : > { %v2233_v48 = vpop.f32.mrf.mxu1  ;;  %v1032_v49 = vpop.f32.mrf.mxu0 }
 0x219   : > { %v1033_v62 = vadd.f32 %v1032_v49, %v909_v29 }
 0x21a   : > { %v1710_v50 = vpop.f32.mrf.mxu0  ;;  %v1724_v51 = vpop.f32.mrf.mxu1 }
 0x21b   : > { %v1153_v25 = vadd.f32 %v1724_v51, %v1026_v16  ;;  %v1054_v4 = vadd.f32 %v1710_v50, %v927_v37  ;;  %v933_v50 = vadd.f32 %v2233_v48, %v796_v40 }
 0x21c   : > { %v1046_v53 = vpop.f32.mrf.mxu0  ;;  %v1144_v54 = vpop.f32.mrf.mxu1 }
 0x21d   : > { %v1145_v32 = vadd.f32 %v1144_v54, %v1019_v23  ;;  %v1047_v43 = vadd.f32 %v1046_v53, %v921_v9 }
 0x21e   : > { %v1713_v56 = vpop.f32.mrf.mxu0 }
 0x21f   : > { %v1727_v57 = vpop.f32.mrf.mxu1  ;;  %v1068_v52 = vadd.f32 %v1713_v56, %v939_v42 }
 0x220   : > { %v2235_v58 = vpop.f32.mrf.mxu0  ;;  %v1169_v2 = vadd.f32 %v1727_v57, %v1040_v30 }
 0x221   : > { %v1160_v59 = vpop.f32.mrf.mxu1  ;;  %v1061_v53 = vadd.f32 %v2235_v58, %v933_v50 }
 0x222   : > { %v1744_v63 = vpop.f32.mrf.mxu0  ;;  %v1161_v39 = vadd.f32 %v1160_v59, %v1033_v62 }
 0x223   : > { %v1730_v0 = vpop.f32.mrf.mxu1  ;;  %v1290_v33 = vadd.f32 %v1744_v63, %v1153_v25 }
 0x224   : > { %v1283_v12 = vpop.f32.mrf.mxu0  ;;  %v1185_v47 = vadd.f32 %v1730_v0, %v1054_v4 }
 0x225   : > { %v1176_v13 = vpop.f32.mrf.mxu1  ;;  %v1284_v3 = vadd.f32 %v1283_v12, %v1145_v32 }
 0x226   : > { %v1747_v17 = vpop.f32.mrf.mxu0  ;;  %v1177_v57 = vadd.f32 %v1176_v13, %v1047_v43 }
 0x227   : > { %v1733_v20 = vpop.f32.mrf.mxu1  ;;  %v1302_v22 = vadd.f32 %v1747_v17, %v1169_v2 }
 0x228   : > { %v1295_v26 = vpop.f32.mrf.mxu0  ;;  %v1201_v61 = vadd.f32 %v1733_v20, %v1068_v52 }
 0x229   : > { %v1192_v28 = vpop.f32.mrf.mxu1  ;;  %v1296_v49 = vadd.f32 %v1295_v26, %v1161_v39 }
 0x22a   : > { %v1750_v34 = vpop.f32.mrf.mxu0  ;;  %v1193_v8 = vadd.f32 %v1192_v28, %v1061_v53 }
 0x22b   : > { %v1764_v19 = vpop.f32.mrf.mxu1  ;;  %v1314_v5 = vadd.f32 %v1750_v34, %v1185_v47 }
 0x22c   : > { %v1407_v60 = vadd.f32 %v1764_v19, %v1290_v33  ;;  %v1307_v7 = vpop.f32.mrf.mxu0 }
 0x22d   : > { %v1400_v31 = vpop.f32.mrf.mxu1  ;;  %v1308_v63 = vadd.f32 %v1307_v7, %v1177_v57 }
 0x22e   : > { %v1447_v36 = vmax.f32 %v1407_v60, 0.0  ;;  %v1401_v27 = vadd.f32 %v1400_v31, %v1284_v3  ;;  %v1753_v54 = vpop.f32.mrf.mxu0 }
 0x22f   : > { %v1767_v45 = vpop.f32.mrf.mxu1  ;;  %v1326_v10 = vadd.f32 %v1753_v54, %v1201_v61 }
 0x230   : > { %1455 = vst.msk [vmem:[%s2241_s10 + $0x8] sm:$0xff] %vm347_vm0, %v1447_v36  ;;  %v1446_v51 = vmax.f32 %v1401_v27, 0.0  ;;  %v1419_v44 = vadd.f32 %v1767_v45, %v1302_v22  ;;  %v1319_v0 = vpop.f32.mrf.mxu0 }
 0x231   : > { %v1412_v55 = vpop.f32.mrf.mxu1  ;;  %v1320_v14 = vadd.f32 %v1319_v0, %v1193_v8 }
 0x232   : > { %1454 = vst.msk [vmem:[%s2241_s10] sm:$0xff] %vm347_vm0, %v1446_v51  ;;  %v1449_v6 = vmax.f32 %v1419_v44, 0.0  ;;  %v1413_v46 = vadd.f32 %v1412_v55, %v1296_v49 }
 0x233   : > { %v1770_v59 = vpop.f32.mrf.mxu1 }
 0x234   : > { %1457 = vst.msk [vmem:[%s2241_s10 + $0x18] sm:$0xff] %vm347_vm0, %v1449_v6  ;;  %v1448_v48 = vmax.f32 %v1413_v46, 0.0  ;;  %v1431_v56 = vadd.f32 %v1770_v59, %v1314_v5 }
 0x235   : > { %v1424_v1 = vpop.f32.mrf.mxu1 }
 0x236   : > { %1456 = vst.msk [vmem:[%s2241_s10 + $0x10] sm:$0xff] %vm347_vm0, %v1448_v48  ;;  %v1451_v12 = vmax.f32 %v1431_v56, 0.0  ;;  %v1425_v13 = vadd.f32 %v1424_v1, %v1308_v63 }
 0x237   : > { %v1773_v58 = vpop.f32.mrf.mxu1 }
 0x238   : > { %1459 = vst.msk [vmem:[%s2241_s10 + $0x28] sm:$0xff] %vm347_vm0, %v1451_v12  ;;  %v1450_v15 = vmax.f32 %v1425_v13, 0.0  ;;  %v1443_v16 = vadd.f32 %v1773_v58, %v1326_v10 }
 0x239   : > { %v1436_v17 = vpop.f32.mrf.mxu1 }
 0x23a   : > { %1458 = vst.msk [vmem:[%s2241_s10 + $0x20] sm:$0xff] %vm347_vm0, %v1450_v15  ;;  %v1453_v18 = vmax.f32 %v1443_v16, 0.0  ;;  %v1437_v20 = vadd.f32 %v1436_v17, %v1320_v14 }
 0x23c   : > { %1461 = vst.msk [vmem:[%s2241_s10 + $0x38] sm:$0xff] %vm347_vm0, %v1453_v18  ;;  %v1452_v11 = vmax.f32 %v1437_v20, 0.0 }
 0x23e   : > { %1460 = vst.msk [vmem:[%s2241_s10 + $0x30] sm:$0xff] %vm347_vm0, %v1452_v11 }
 0x23f PF: > { %s15_s20 = sadd.s32 1, %s1843_s20   ;;  %s2277_s18 = smov %s1839_s19 }
 0x240   : > { %p12_p5 = scmp.ge.s32.totalorder %s15_s20, 4   ;;  %s2278_s19 = smov %s2280_s21 }
 0x242   :  { %14 = sbr.rel (!%p12_p5) target bundleno = 2 (0x2), region = 73 }

</bundles_post_ra>
